<compile_context>
chip_gen: v5e
topology: v5e:2x2
jax: 0.10.0
libtpu: 0.0.40
codegen_flags: <defaults>
</compile_context>

<pallas_src>
import functools

import jax
import jax.numpy as jnp
from jax import lax
from jax.experimental import pallas as pl
from jax.experimental.pallas import tpu as pltpu

NUM_FEATURES = 4
NUM_CLASSES = 10
EPS = 1e-5  # nn.BatchNorm2d default


def cbn_kernel(x_ref, g_ref, b_ref, o_ref, *, inv_count):
    # x_ref: (N, C_b, HW) block, resident for the full (N, HW) extent.
    # g_ref, b_ref: (N, C_b, 1) per-(sample, channel) gamma / beta.
    x = x_ref[...].astype(jnp.float32)

    # ---- single-pass per-channel batch statistics (biased), f32 accum -------
    row_s = jnp.sum(x, axis=2, keepdims=True)          # (N, C_b, 1)  lane reduce
    row_q = jnp.sum(x * x, axis=2, keepdims=True)      # (N, C_b, 1)
    s = jnp.sum(row_s, axis=0, keepdims=True)          # (1, C_b, 1)  cross-sample
    q = jnp.sum(row_q, axis=0, keepdims=True)          # (1, C_b, 1)
    mean = s * inv_count
    var = jnp.maximum(q * inv_count - mean * mean, 0.0)
    inv_std = lax.rsqrt(var + EPS)                      # EUP

    # ---- fold conditional affine into the normalization (tiny operands) -----
    gamma = g_ref[...].astype(jnp.float32)              # (N, C_b, 1)
    beta = b_ref[...].astype(jnp.float32)               # (N, C_b, 1)
    scale = gamma * inv_std                             # (N, C_b, 1)
    shift = beta - mean * scale                         # (N, C_b, 1)

    # ---- single full-tile FMA ------------------------------------------------
    o_ref[...] = (x * scale + shift).astype(o_ref.dtype)


def _choose_channel_block(C, N, HW, x_itemsize, budget_bytes):
    """Largest channel block C_b (C_b == C, or C_b % 8 == 0 and C % C_b == 0)
    whose resident working set fits the VMEM budget."""
    def working_set(cb):
        # double-buffered input + double-buffered output + ~2 f32 temporaries
        return N * cb * HW * (4 * x_itemsize + 8)

    if working_set(C) <= budget_bytes or C % 8 != 0:
        return C  # whole-C block (demo-sized, or C not sublane-tileable)
    best = 8
    cb = 8
    while cb <= C:
        if C % cb == 0 and working_set(cb) <= budget_bytes:
            best = cb
        cb += 8
    return best


def conditional_batch_norm_2d(x, y, embed_weight, num_features=NUM_FEATURES,
                              channel_block=None,
                              vmem_budget_bytes=24 << 20):
    """x: (N, C, H, W) float, y: (N,) int labels, embed_weight: (num_classes, 2*C)."""
    N, C, H, W = x.shape
    assert C == num_features
    HW = H * W
    assert HW % 128 == 0, "spatial extent must be lane-tileable (H*W % 128 == 0)"

    # ---- class-conditional gamma/beta gather: tiny (N, 2C), done in XLA -----
    emb = jnp.take(embed_weight.astype(jnp.float32), y.astype(jnp.int32), axis=0)
    gamma = emb[:, :C].reshape(N, C, 1)
    beta = emb[:, C:].reshape(N, C, 1)

    # ---- layout: (N, C, HW); spatial on lanes, contiguous reshape (no copy) -
    x3 = x.reshape(N, C, HW)

    C_b = channel_block or _choose_channel_block(
        C, N, HW, x.dtype.itemsize, vmem_budget_bytes)
    assert C % C_b == 0 and (C_b == C or C_b % 8 == 0)
    grid = (C // C_b,)

    # VMEM request: generous margin, capped at 64 MiB (safe on v7x as well as
    # the 128 MiB v5e/v6e parts).
    ws = N * C_b * HW * (4 * x.dtype.itemsize + 8)
    gb = 4 * N * ((C_b + 7) // 8 * 8) * 128 * 4          # padded gamma+beta blocks
    vmem_limit = int(min(max(2 * (ws + gb), 16 << 20), 64 << 20))

    cost = pl.CostEstimate(
        flops=6 * N * C * HW,
        transcendentals=C,
        bytes_accessed=2 * N * C * HW * x.dtype.itemsize + 2 * N * C * 4,
    )

    kernel = functools.partial(cbn_kernel, inv_count=1.0 / float(N * HW))
    out3 = pl.pallas_call(
        kernel,
        out_shape=jax.ShapeDtypeStruct((N, C, HW), x.dtype),
        grid=grid,
        in_specs=[
            pl.BlockSpec((N, C_b, HW), lambda cb: (0, cb, 0)),  # x
            pl.BlockSpec((N, C_b, 1), lambda cb: (0, cb, 0)),   # gamma
            pl.BlockSpec((N, C_b, 1), lambda cb: (0, cb, 0)),   # beta
        ],
        out_specs=pl.BlockSpec((N, C_b, HW), lambda cb: (0, cb, 0)),
        compiler_params=pltpu.CompilerParams(
            dimension_semantics=("parallel",),
            vmem_limit_bytes=vmem_limit),
        cost_estimate=cost,
    )(x3, gamma, beta)
    return out3.reshape(N, C, H, W)


def reference(x, y, embed_weight, num_features=NUM_FEATURES):
    """Plain-JAX reference matching the PyTorch forward (training mode)."""
    x = x.astype(jnp.float32)
    mean = jnp.mean(x, axis=(0, 2, 3), keepdims=True)
    var = jnp.mean((x - mean) ** 2, axis=(0, 2, 3), keepdims=True)  # biased
    xn = (x - mean) / jnp.sqrt(var + EPS)
    emb = jnp.take(embed_weight, y.astype(jnp.int32), axis=0)
    gamma = emb[:, :num_features][:, :, None, None]
    beta = emb[:, num_features:][:, :, None, None]
    return gamma * xn + beta


if __name__ == "__main__":
    key = jax.random.PRNGKey(0)
    kx, ke = jax.random.split(key)

    N, C, H, W = 2, NUM_FEATURES, 16, 16
    x = jax.random.normal(kx, (N, C, H, W), dtype=jnp.float32)
    y = jnp.array([1, 3], dtype=jnp.int32)

    # Parameter init per module __init__: first half (gamma) = 1, second half
    # (beta) = 0.  A small deterministic perturbation is added so the
    # per-class conditional path is actually exercised.
    embed_weight = jnp.concatenate(
        [jnp.ones((NUM_CLASSES, NUM_FEATURES), jnp.float32),
         jnp.zeros((NUM_CLASSES, NUM_FEATURES), jnp.float32)], axis=1)
    embed_weight = embed_weight + 0.1 * jax.random.normal(
        ke, embed_weight.shape, dtype=jnp.float32)

    out = conditional_batch_norm_2d(x, y, embed_weight)
    out = jax.block_until_ready(out)

    ref = reference(x, y, embed_weight)
    assert out.shape == (N, C, H, W)
    assert jnp.allclose(out, ref, atol=1e-5, rtol=1e-5), "mismatch vs reference"
    print("KERNEL_OK")
</pallas_src>

<mosaic_0001>
module attributes {stable_mosaic.version = 11 : i64} {
  func.func @cbn_kernel(%arg0: i32, %arg1: memref<2x4x256xf32, #tpu.memory_space<vmem>>, %arg2: memref<2x4x1xf32, #tpu.memory_space<vmem>>, %arg3: memref<2x4x1xf32, #tpu.memory_space<vmem>>, %arg4: memref<2x4x256xf32, #tpu.memory_space<vmem>>) attributes {dimension_semantics = [#tpu.dimension_semantics<parallel>], iteration_bounds = array<i64: 1>, scalar_prefetch = 0 : i64, scratch_operands = 0 : i64, tpu.core_type = #tpu.core_type<tc>, window_params = [{transform_indices = @transform_0, window_bounds = array<i64: 2, 4, 256>}, {transform_indices = @transform_1, window_bounds = array<i64: 2, 4, 1>}, {transform_indices = @transform_2, window_bounds = array<i64: 2, 4, 1>}, {transform_indices = @transform_3, window_bounds = array<i64: 2, 4, 256>}]} {
    %c0 = arith.constant 0 : index
    %c0_0 = arith.constant 0 : index
    %c0_1 = arith.constant 0 : index
    %0 = vector.load %arg1[%c0, %c0_0, %c0_1] : memref<2x4x256xf32, #tpu.memory_space<vmem>>, vector<2x4x256xf32>
    %cst = arith.constant dense<0.000000e+00> : vector<2x4xf32>
    %1 = vector.multi_reduction <add>, %0, %cst [2] : vector<2x4x256xf32> to vector<2x4xf32>
    %2 = vector.shape_cast %1 : vector<2x4xf32> to vector<2x4x1xf32>
    %3 = arith.mulf %0, %0 : vector<2x4x256xf32>
    %cst_2 = arith.constant dense<0.000000e+00> : vector<2x4xf32>
    %4 = vector.multi_reduction <add>, %3, %cst_2 [2] : vector<2x4x256xf32> to vector<2x4xf32>
    %5 = vector.shape_cast %4 : vector<2x4xf32> to vector<2x4x1xf32>
    %cst_3 = arith.constant dense<0.000000e+00> : vector<4x1xf32>
    %6 = vector.multi_reduction <add>, %2, %cst_3 [0] : vector<2x4x1xf32> to vector<4x1xf32>
    %7 = vector.shape_cast %6 : vector<4x1xf32> to vector<1x4x1xf32>
    %cst_4 = arith.constant dense<0.000000e+00> : vector<4x1xf32>
    %8 = vector.multi_reduction <add>, %5, %cst_4 [0] : vector<2x4x1xf32> to vector<4x1xf32>
    %9 = vector.shape_cast %8 : vector<4x1xf32> to vector<1x4x1xf32>
    %cst_5 = arith.constant 0.001953125 : f32
    %10 = vector.broadcast %cst_5 : f32 to vector<1x4x1xf32>
    %11 = arith.mulf %7, %10 : vector<1x4x1xf32>
    %cst_6 = arith.constant 0.001953125 : f32
    %12 = vector.broadcast %cst_6 : f32 to vector<1x4x1xf32>
    %13 = arith.mulf %9, %12 : vector<1x4x1xf32>
    %14 = arith.mulf %11, %11 : vector<1x4x1xf32>
    %15 = arith.subf %13, %14 : vector<1x4x1xf32>
    %cst_7 = arith.constant 0.000000e+00 : f32
    %16 = vector.broadcast %cst_7 : f32 to vector<1x4x1xf32>
    %17 = arith.maximumf %15, %16 : vector<1x4x1xf32>
    %cst_8 = arith.constant 9.99999974E-6 : f32
    %18 = vector.broadcast %cst_8 : f32 to vector<1x4x1xf32>
    %19 = arith.addf %17, %18 : vector<1x4x1xf32>
    %20 = math.rsqrt %19 : vector<1x4x1xf32>
    %c0_9 = arith.constant 0 : index
    %c0_10 = arith.constant 0 : index
    %c0_11 = arith.constant 0 : index
    %21 = vector.load %arg2[%c0_9, %c0_10, %c0_11] : memref<2x4x1xf32, #tpu.memory_space<vmem>>, vector<2x4x1xf32>
    %c0_12 = arith.constant 0 : index
    %c0_13 = arith.constant 0 : index
    %c0_14 = arith.constant 0 : index
    %22 = vector.load %arg3[%c0_12, %c0_13, %c0_14] : memref<2x4x1xf32, #tpu.memory_space<vmem>>, vector<2x4x1xf32>
    %23 = vector.broadcast %20 : vector<1x4x1xf32> to vector<2x4x1xf32>
    %24 = arith.mulf %21, %23 : vector<2x4x1xf32>
    %25 = vector.broadcast %11 : vector<1x4x1xf32> to vector<2x4x1xf32>
    %26 = arith.mulf %25, %24 : vector<2x4x1xf32>
    %27 = arith.subf %22, %26 : vector<2x4x1xf32>
    %28 = vector.broadcast %24 : vector<2x4x1xf32> to vector<2x4x256xf32>
    %29 = arith.mulf %0, %28 : vector<2x4x256xf32>
    %30 = vector.broadcast %27 : vector<2x4x1xf32> to vector<2x4x256xf32>
    %31 = arith.addf %29, %30 : vector<2x4x256xf32>
    %c0_15 = arith.constant 0 : index
    %c0_16 = arith.constant 0 : index
    %c0_17 = arith.constant 0 : index
    %32 = vector.load %arg4[%c0_15, %c0_16, %c0_17] : memref<2x4x256xf32, #tpu.memory_space<vmem>>, vector<2x4x256xf32>
    tpu.vector_store %arg4[%c0_15, %c0_16, %c0_17], %31 {strides = array<i32>} : memref<2x4x256xf32, #tpu.memory_space<vmem>>, vector<2x4x256xf32>,
    return
  }
  func.func @transform_0(%arg0: i32) -> (i32, i32, i32) {
    %c0_i32 = arith.constant 0 : i32
    %c0_i32_0 = arith.constant 0 : i32
    %c0_i32_1 = arith.constant 0 : i32
    return %c0_i32, %arg0, %c0_i32_0 : i32, i32, i32
  }
  func.func @transform_1(%arg0: i32) -> (i32, i32, i32) {
    %c0_i32 = arith.constant 0 : i32
    %c0_i32_0 = arith.constant 0 : i32
    %c0_i32_1 = arith.constant 0 : i32
    return %c0_i32, %arg0, %c0_i32_0 : i32, i32, i32
  }
  func.func @transform_2(%arg0: i32) -> (i32, i32, i32) {
    %c0_i32 = arith.constant 0 : i32
    %c0_i32_0 = arith.constant 0 : i32
    %c0_i32_1 = arith.constant 0 : i32
    return %c0_i32, %arg0, %c0_i32_0 : i32, i32, i32
  }
  func.func @transform_3(%arg0: i32) -> (i32, i32, i32) {
    %c0_i32 = arith.constant 0 : i32
    %c0_i32_0 = arith.constant 0 : i32
    %c0_i32_1 = arith.constant 0 : i32
    return %c0_i32, %arg0, %c0_i32_0 : i32, i32, i32
  }
}

</mosaic_0001>

<bundles_post_ra>
// kernel: tpu_custom_call.1
= control target key start
LH: loop header
LB: loop body
LE: loop exit
PB: predicated region body
PF: predicated region fallthrough
CT: control target
= control target key end

     0   :  { %s264_s0 = inlined_call_operand.vmem [shape: f32[2,4,256], index: 0, kind: input, shape index: {}]   ;;  %s265_s1 = inlined_call_operand.vmem [shape: f32[2,4,1], index: 1, kind: input, shape index: {}]   ;;  %s266_s2 = inlined_call_operand.vmem [shape: f32[2,4,1], index: 2, kind: input, shape index: {}]   ;;  %s267_s3 = inlined_call_operand.hbm [shape: f32[2,4,256], index: 3, kind: output, shape index: {}]  }
   0x1   :  { %v222_v0 = vld [vmem:[%s264_s0] sm:$0xff]  ;;  %v227_v1 = vld [vmem:[%s264_s0 + $0x8] sm:$0xff] }
   0x2   :  { %8 = vsyncpa [#allocation3], 0  ;;  %19 = vst [vmem:[#allocation1] ss:$2 sm:$0xff] %v222_v0  ;;  %v41_v2 = vmul.f32 %v222_v0, %v222_v0  ;;  %vm30_vm0 = vcmask 1043456   ;;  %v42_v3 = vmul.f32 %v227_v1, %v227_v1  ;;  %v194_v25 = vmov 0  }
   0x3   :  { %23 = vst [vmem:[#allocation1 + $0x10] ss:$2 sm:$0xff] %v227_v1  ;;  %163 = vset.pattern.permute.xlu2 %v194_v25  ;;  %165 = vset.pattern.permute.xlu1 %v194_v25  ;;  %v88_v47 = vld [vmem:[%s265_s1] sm:$0xf]  ;;  %v89_v48 = vld [vmem:[%s265_s1 + $0x4] sm:$0xf] }
   0x4   :  { %164 = vset.pattern.permute.xlu0 %v194_v25  ;;  %v91_v52 = vld [vmem:[%s266_s2 + $0x4] sm:$0xf]  ;;  %v90_v53 = vld [vmem:[%s266_s2] sm:$0xf]  ;;  %v195_v59 = vmov 839922192  }
   0x5   :  { %v107_v60 = vunpack.c.l.s4 %v195_v59  ;;  %s196_s1 = smov [#allocation2]   ;;  %s146_s25 = sshll.u32 %s267_s3, 4  ;;  %s147_s25 = int_to_ptr.hbm [resolvable:$true] %s146_s25 }
   0x6   :  { %s144_s23 = sshll.u32 %s196_s1, 4  ;;  %s197_s26 = smov 128   ;;  %s145_s23 = int_to_ptr.vmem [resolvable:$true] %s144_s23 }
   0x7   :  { %v108_v61 = vunpack.c.0.s8 %v107_v60  ;;  %s198_s27 = smov 8  }
   0x9   :  { %v20_v4 = vld.sshfl [vmem:[#allocation1] sm:$0xff pattern:$0x75316420]  ;;  %v21_v5 = vld.sshfl [vmem:[#allocation1 + $0x8] sm:$0xff pattern:$0x75316420] }
   0xa   :  { %v31_v6 = vsel %vm30_vm0, %v20_v4, 0.0  ;;  %v32_v7 = vsel %vm30_vm0, %v21_v5, 0.0  ;;  %45 = vst [vmem:[#allocation1] ss:$2 sm:$0xff] %v41_v2 }
   0xb   :  { %v33_v8 = vadd.f32 %v32_v7, %v31_v6  ;;  %v24_v9 = vld.sshfl [vmem:[#allocation1 + $0x10] sm:$0xff pattern:$0x75316420]  ;;  %v25_v10 = vld.sshfl [vmem:[#allocation1 + $0x18] sm:$0xff pattern:$0x75316420] }
   0xc   :  { %49 = vst [vmem:[#allocation1 + $0x10] ss:$2 sm:$0xff] %v42_v3  ;;  %v36_v11 = vsel %vm30_vm0, %v24_v9, 0.0  ;;  %v37_v12 = vsel %vm30_vm0, %v25_v10, 0.0 }
   0xd   :  { %34 = vadd.xlane.f32.xlu0 %v33_v8  ;;  %v38_v15 = vadd.f32 %v37_v12, %v36_v11 }
  0x11   :  { %v46_v13 = vld.sshfl [vmem:[#allocation1] sm:$0xff pattern:$0x75316420]  ;;  %v47_v14 = vld.sshfl [vmem:[#allocation1 + $0x8] sm:$0xff pattern:$0x75316420] }
  0x12   :  { %v56_v16 = vsel %vm30_vm0, %v46_v13, 0.0  ;;  %v57_v17 = vsel %vm30_vm0, %v47_v14, 0.0 }
  0x13   :  { %v58_v18 = vadd.f32 %v57_v17, %v56_v16  ;;  %v50_v19 = vld.sshfl [vmem:[#allocation1 + $0x10] sm:$0xff pattern:$0x75316420]  ;;  %v51_v20 = vld.sshfl [vmem:[#allocation1 + $0x18] sm:$0xff pattern:$0x75316420] }
  0x14   :  { %v61_v21 = vsel %vm30_vm0, %v50_v19, 0.0  ;;  %v62_v22 = vsel %vm30_vm0, %v51_v20, 0.0 }
  0x15   :  { %59 = vadd.xlane.f32.xlu1 %v58_v18  ;;  %39 = vadd.xlane.f32.xlu0 %v38_v15  ;;  %v63_v23 = vadd.f32 %v62_v22, %v61_v21 }
  0x1d   :  { %64 = vadd.xlane.f32.xlu1 %v63_v23 }
  0x80   :  { %v35_v24 = vpop.xlane.xlu0 %34 }
  0x81   :  { %v66_v29 = vsel %vm30_vm0, %v35_v24, 0.0 }
  0x88   :  { %v60_v26 = vpop.xlane.xlu1 %59  ;;  %v40_v27 = vpop.xlane.xlu0 %39 }
  0x89   :  { %v67_v28 = vsel %vm30_vm0, %v40_v27, 0.0  ;;  %v69_v33 = vsel %vm30_vm0, %v60_v26, 0.0 }
  0x8a   :  { %v68_v30 = vadd.f32 %v67_v28, %v66_v29 }
  0x8c   :  { %v72_v31 = vmul.f32 0.001953125, %v68_v30 }
  0x8e   :  { %v74_v37 = vmul.f32 %v72_v31, %v72_v31 }
  0x90   :  { %v65_v32 = vpop.xlane.xlu1 %64 }
  0x91   :  { %v70_v34 = vsel %vm30_vm0, %v65_v32, 0.0 }
  0x92   :  { %v71_v35 = vadd.f32 %v70_v34, %v69_v33 }
  0x94   :  { %v73_v36 = vmul.f32 0.001953125, %v71_v35 }
  0x96   :  { %v75_v38 = vsub.f32 %v73_v36, %v74_v37 }
  0x98   :  { %v76_v39 = vmax.f32 %v75_v38, 0.0 }
  0x9a   :  { %v77_v40 = vadd.f32 1e-05, %v76_v39 }
  0x9c   :  { %166 = vrsqrt.f32 %v77_v40  ;;  %vm84_vm2 = vweird.f32 %v77_v40 }
  0xa2   :  { %v167_v41 = vpop.eup %166 }
  0xa3   :  { %v79_v42 = vmul.f32 %v167_v41, %v77_v40  ;;  %vm85_vm1 = vweird.f32 %v167_v41 }
  0xa4   :  { %vm86_vm3 = vmor %vm84_vm2, %vm85_vm1 }
  0xa5   :  { %v80_v43 = vmul.f32 %v167_v41, %v79_v42 }
  0xa7   :  { %v81_v44 = vmul.f32 0.5, %v80_v43 }
  0xa9   :  { %v82_v45 = vsub.f32 1.5, %v81_v44 }
  0xab   :  { %v83_v46 = vmul.f32 %v167_v41, %v82_v45 }
  0xad   :  { %v87_v49 = vsel %vm86_vm3, %v167_v41, %v83_v46 }
  0xae   :  { %v92_v50 = vmul.f32 %v88_v47, %v87_v49  ;;  %v93_v51 = vmul.f32 %v89_v48, %v87_v49 }
  0xb0   :  { %v95_v54 = vmul.f32 %v93_v51, %v72_v31  ;;  %100 = vperm.xlu2 %163, %v92_v50   ;;  %v94_v55 = vmul.f32 %v92_v50, %v72_v31 }
  0xb2   :  { %v97_v56 = vsub.f32 %v91_v52, %v95_v54  ;;  %v96_v57 = vsub.f32 %v90_v53, %v94_v55 }
  0xb4   :  { %124 = vperm.xlu1 %165, %v97_v56   ;;  %120 = vperm.xlu0 %164, %v96_v57  }
  0xb8   :  { %104 = vperm.xlu2 %163, %v93_v51  }
 0x10a   :  { %v101_v58 = vpop.permute.xlu2 %100 }
 0x10b   :  { %v109_v63 = vperm.slane %v101_v58, %v108_v61 }
 0x10d   :  { %v116_v5 = vmul.f32 %v109_v63, %v222_v0 }
 0x112   :  { %v105_v62 = vpop.permute.xlu2 %104 }
 0x113   :  { %v113_v2 = vperm.slane %v105_v62, %v108_v61 }
 0x115   :  { %v117_v6 = vmul.f32 %v113_v2, %v227_v1 }
 0x126   :  { %v125_v3 = vpop.permute.xlu1 %124  ;;  %v121_v4 = vpop.permute.xlu0 %120 }
 0x127   :  { %v133_v7 = vperm.slane %v125_v3, %v108_v61  ;;  %v129_v8 = vperm.slane %v121_v4, %v108_v61 }
 0x129   :  { %v137_v9 = vadd.f32 %v133_v7, %v117_v6  ;;  %v136_v10 = vadd.f32 %v129_v8, %v116_v5 }
 0x12b   :  { %139 = vst [vmem:[#allocation2 + $0x8] sm:$0xff] %v137_v9 }
 0x12c   :  { %138 = vst [vmem:[#allocation2] sm:$0xff] %v136_v10 }
 0x12d   :  { %152 = dma.vmem_to_hbm [thread:$0]  %s145_s23, 256, %s147_s25, [#allocation3], %s197_s26, %s197_s26, %s198_s27  }
 0x12e   :  { %192 = dma.done.wait [#allocation3], 256  }
 0x12f   :  { %193 = vsyncadd [#allocation3], 4294967040 }
 0x130   :  { %157 = vsyncpa [#allocation3], 1 }

</bundles_post_ra>
